<compile_context>
chip_gen: v5e
topology: v5e:2x2
jax: 0.10.0
libtpu: 0.0.40
codegen_flags: <defaults>
</compile_context>

<pallas_src>
import functools
import math

import jax
import jax.numpy as jnp
from jax.experimental import pallas as pl
from jax.experimental.pallas import tpu as pltpu


# ----------------------------- config ---------------------------------------
class Config:
    kernel_size = 32                 # embed_dim
    num_heads = 4
    attention_size = 8
    value_size = 8                   # must equal attention_size (view bug in reference)
    attention_probs_dropout_prob = 0.0
    hidden_dropout_prob = 0.0


# ----------------------------- kernel ---------------------------------------
def _mha_kernel(x_ref, wqkv_ref, wout_ref, o_ref, *, num_heads, attention_size):
    """Whole-batch multi-head attention, single invocation (no grid).

    x_ref    : (B, S, E)            activations
    wqkv_ref : (E, H*(2A+V))        fused QKV projection weight (lane-dense)
    wout_ref : (H*A, E)             output projection weight (lane-dense)
    o_ref    : (B, S, E)
    """
    B, S, E = x_ref.shape
    H, A = num_heads, attention_size
    HA = H * A
    M = B * S          # batch folded into the M (sublane) dim
    G = H * B          # (head, batch) groups for the score/context matmuls
    scale = 1.0 / math.sqrt(A)

    # (B, S, E) -> (M, E): leading-dim merge only, no relayout.
    x2 = x_ref[...].reshape(M, E)

    # Fused Q/K/V projection: ONE lane-dense MXU matmul (K = E = 32, N = 3*HA = 96)
    # replacing 3*H*B tiny 8-lane-output matmuls.
    qkv = jnp.dot(x2, wqkv_ref[...], preferred_element_type=jnp.float32)  # (M, 3*HA)
    qkv3 = qkv.reshape(B, S, 3 * HA)                                      # leading split

    def head_group(col0):
        # Static lane slices per head, stacked along a NEW leading axis, then a
        # leading-dim-only reshape: (H, B, S, A) -> (G, S, A) with g = h*B + b.
        heads = jnp.stack(
            [qkv3[:, :, col0 + h * A: col0 + (h + 1) * A] for h in range(H)], axis=0)
        return heads.reshape(G, S, A)

    q_g = head_group(0)          # (G, S, A)
    k_g = head_group(HA)         # (G, S, A)
    v_g = head_group(2 * HA)     # (G, S, A)   (value_size == attention_size)

    # Scores for all (head, batch) groups + ONE stacked, numerically-stable softmax.
    # (attention_dropout / hidden_dropout are identity in eval / prob = 0.)
    att = jnp.einsum("gsa,gta->gst", q_g, k_g,
                     preferred_element_type=jnp.float32) * scale          # (G, S, S)
    m = jnp.max(att, axis=-1, keepdims=True)
    ex = jnp.exp(att - m)
    denom = jnp.sum(ex, axis=-1, keepdims=True)
    r = pl.reciprocal(denom, approx=True)       # EUP slot
    r = r * (2.0 - denom * r)                   # one Newton step -> full f32 accuracy
    p = ex * r

    ctx = jnp.einsum("gst,gta->gsa", p, v_g,
                     preferred_element_type=jnp.float32)                  # (G, S, A)

    # Lane-concat the heads back into one (M, H*A) tile (4 cheap 8-lane writes) and
    # do ONE output-projection matmul against the original (H*A, E) weight.
    ctx4 = ctx.reshape(H, B, S, A)                                        # leading split
    ctx_cat = jnp.concatenate([ctx4[h] for h in range(H)], axis=-1)       # (B, S, HA)
    out = jnp.dot(ctx_cat.reshape(M, HA), wout_ref[...],
                  preferred_element_type=jnp.float32)                     # (M, E)

    o_ref[...] = out.reshape(B, S, E).astype(o_ref.dtype)


# ----------------------------- wrapper ---------------------------------------
def attention_forward(node, w_qkv, w_out, cfg):
    """node: (B,S,E); w_qkv: (E, H*(2A+V)) (nn.Linear weight, stored transposed);
    w_out: (H*A, E)."""
    B, S, E = node.shape
    H, A, V = cfg.num_heads, cfg.attention_size, cfg.value_size
    assert E == cfg.kernel_size
    # The reference module views `v` with attention_size; fail loudly if the
    # config would silently mis-slice V.
    assert V == A, "AttentionKernel requires value_size == attention_size"
    assert w_qkv.shape == (E, H * (2 * A + V))
    assert w_out.shape == (H * A, E)

    flops = (2 * B * S * E * H * (2 * A + V)       # fused QKV projection
             + 2 * B * H * S * S * (A + V)         # scores + att @ v
             + 2 * B * S * H * A * E)              # output projection
    bytes_accessed = 4 * (node.size + w_qkv.size + w_out.size + B * S * E)
    cost = pl.CostEstimate(flops=flops, transcendentals=B * H * S * S,
                           bytes_accessed=bytes_accessed)

    kernel = functools.partial(_mha_kernel, num_heads=H, attention_size=A)

    # Single kernel invocation: the whole working set is a few tens of KB, far
    # below VMEM on v5e/v6e (128 MiB) and v7x (64 MiB).  For large B, bring back
    # a batch grid with dimension_semantics=("parallel",) (uses both v7x TCs);
    # for large S, tile the KV axis flash-style and size tiles against v7x's
    # 64 MiB VMEM.
    return pl.pallas_call(
        kernel,
        out_shape=jax.ShapeDtypeStruct((B, S, E), node.dtype),
        in_specs=[pl.BlockSpec(memory_space=pltpu.MemorySpace.VMEM)
                  for _ in range(3)],
        out_specs=pl.BlockSpec(memory_space=pltpu.MemorySpace.VMEM),
        cost_estimate=cost,
    )(node, w_qkv, w_out)


# ----------------------------- pure-JAX reference ----------------------------
def attention_reference(node, w_qkv, w_out, cfg):
    B, S, E = node.shape
    H, A, V = cfg.num_heads, cfg.attention_size, cfg.value_size
    qkv = node @ w_qkv                                       # (B, S, H*(2A+V))
    q, k, v = jnp.split(qkv, [H * A, 2 * H * A], axis=-1)
    q = q.reshape(B, S, H, A).transpose(0, 2, 1, 3)          # (B,H,S,A)
    k = k.reshape(B, S, H, A).transpose(0, 2, 3, 1)          # (B,H,A,S)
    v = v.reshape(B, S, H, A).transpose(0, 2, 1, 3)          # (B,H,S,A)  (A==V)
    att = jnp.einsum("bhsa,bhat->bhst", q, k) / math.sqrt(A)
    att = jax.nn.softmax(att, axis=-1)
    o = jnp.einsum("bhst,bhta->bhsa", att, v)                # (B,H,S,A)
    o = o.transpose(0, 2, 1, 3).reshape(B, S, H * A)
    return o @ w_out


# ----------------------------- main ------------------------------------------
if __name__ == "__main__":
    cfg = Config()
    B, S, E = 2, 8, cfg.kernel_size
    H, A, V = cfg.num_heads, cfg.attention_size, cfg.value_size
    qkv_dim = H * (2 * A + V)

    key = jax.random.PRNGKey(0)
    k_x, k_qkv, k_out = jax.random.split(key, 3)

    node = jax.random.normal(k_x, (B, S, E), dtype=jnp.float32)
    # Linear weights stored as (in_dim, out_dim), i.e. transposed vs nn.Linear.
    w_qkv = jax.random.normal(k_qkv, (E, qkv_dim), dtype=jnp.float32) * (1.0 / math.sqrt(E))
    w_out = jax.random.normal(k_out, (H * A, E), dtype=jnp.float32) * (1.0 / math.sqrt(H * A))

    out = attention_forward(node, w_qkv, w_out, cfg)
    out = jax.block_until_ready(out)

    ref = attention_reference(node, w_qkv, w_out, cfg)
    assert out.shape == (B, S, E)
    assert jnp.allclose(out, ref, atol=1e-4, rtol=1e-4), "mismatch vs reference"

    print("KERNEL_OK")
</pallas_src>

<mosaic_0001>
module attributes {stable_mosaic.version = 11 : i64} {
  func.func @_mha_kernel(%arg0: memref<2x8x32xf32, #tpu.memory_space<vmem>>, %arg1: memref<32x96xf32, #tpu.memory_space<vmem>>, %arg2: memref<32x32xf32, #tpu.memory_space<vmem>>, %arg3: memref<2x8x32xf32, #tpu.memory_space<vmem>>) attributes {dimension_semantics = [], scalar_prefetch = 0 : i64, scratch_operands = 0 : i64, tpu.core_type = #tpu.core_type<tc>} {
    %c0 = arith.constant 0 : index
    %c0_0 = arith.constant 0 : index
    %c0_1 = arith.constant 0 : index
    %0 = vector.load %arg0[%c0, %c0_0, %c0_1] : memref<2x8x32xf32, #tpu.memory_space<vmem>>, vector<2x8x32xf32>
    %1 = vector.shape_cast %0 : vector<2x8x32xf32> to vector<16x32xf32>
    %c0_2 = arith.constant 0 : index
    %c0_3 = arith.constant 0 : index
    %2 = vector.load %arg1[%c0_2, %c0_3] : memref<32x96xf32, #tpu.memory_space<vmem>>, vector<32x96xf32>
    %cst = arith.constant dense<0.000000e+00> : vector<16x96xf32>
    %3 = tpu.matmul %1, %2, %cst {dimension_numbers = #tpu.dot_dimension_numbers<[1], [0], [0], [1], [0, 0, 1, 1], [], []>} : vector<16x32xf32>, vector<32x96xf32>, vector<16x96xf32> -> vector<16x96xf32>
    %4 = vector.shape_cast %3 : vector<16x96xf32> to vector<2x8x96xf32>
    %5 = vector.extract_strided_slice %4 {offsets = [0, 0, 0], sizes = [2, 8, 8], strides = [1, 1, 1]} : vector<2x8x96xf32> to vector<2x8x8xf32>
    %6 = vector.extract_strided_slice %4 {offsets = [0, 0, 8], sizes = [2, 8, 8], strides = [1, 1, 1]} : vector<2x8x96xf32> to vector<2x8x8xf32>
    %7 = vector.extract_strided_slice %4 {offsets = [0, 0, 16], sizes = [2, 8, 8], strides = [1, 1, 1]} : vector<2x8x96xf32> to vector<2x8x8xf32>
    %8 = vector.extract_strided_slice %4 {offsets = [0, 0, 24], sizes = [2, 8, 8], strides = [1, 1, 1]} : vector<2x8x96xf32> to vector<2x8x8xf32>
    %9 = vector.shape_cast %5 : vector<2x8x8xf32> to vector<1x2x8x8xf32>
    %10 = vector.shape_cast %6 : vector<2x8x8xf32> to vector<1x2x8x8xf32>
    %11 = vector.shape_cast %7 : vector<2x8x8xf32> to vector<1x2x8x8xf32>
    %12 = vector.shape_cast %8 : vector<2x8x8xf32> to vector<1x2x8x8xf32>
    %13 = tpu.concatenate %9, %10, %11, %12 in 0 : vector<1x2x8x8xf32>, vector<1x2x8x8xf32>, vector<1x2x8x8xf32>, vector<1x2x8x8xf32> -> vector<4x2x8x8xf32>
    %14 = vector.shape_cast %13 : vector<4x2x8x8xf32> to vector<8x8x8xf32>
    %15 = vector.extract_strided_slice %4 {offsets = [0, 0, 32], sizes = [2, 8, 8], strides = [1, 1, 1]} : vector<2x8x96xf32> to vector<2x8x8xf32>
    %16 = vector.extract_strided_slice %4 {offsets = [0, 0, 40], sizes = [2, 8, 8], strides = [1, 1, 1]} : vector<2x8x96xf32> to vector<2x8x8xf32>
    %17 = vector.extract_strided_slice %4 {offsets = [0, 0, 48], sizes = [2, 8, 8], strides = [1, 1, 1]} : vector<2x8x96xf32> to vector<2x8x8xf32>
    %18 = vector.extract_strided_slice %4 {offsets = [0, 0, 56], sizes = [2, 8, 8], strides = [1, 1, 1]} : vector<2x8x96xf32> to vector<2x8x8xf32>
    %19 = vector.shape_cast %15 : vector<2x8x8xf32> to vector<1x2x8x8xf32>
    %20 = vector.shape_cast %16 : vector<2x8x8xf32> to vector<1x2x8x8xf32>
    %21 = vector.shape_cast %17 : vector<2x8x8xf32> to vector<1x2x8x8xf32>
    %22 = vector.shape_cast %18 : vector<2x8x8xf32> to vector<1x2x8x8xf32>
    %23 = tpu.concatenate %19, %20, %21, %22 in 0 : vector<1x2x8x8xf32>, vector<1x2x8x8xf32>, vector<1x2x8x8xf32>, vector<1x2x8x8xf32> -> vector<4x2x8x8xf32>
    %24 = vector.shape_cast %23 : vector<4x2x8x8xf32> to vector<8x8x8xf32>
    %25 = vector.extract_strided_slice %4 {offsets = [0, 0, 64], sizes = [2, 8, 8], strides = [1, 1, 1]} : vector<2x8x96xf32> to vector<2x8x8xf32>
    %26 = vector.extract_strided_slice %4 {offsets = [0, 0, 72], sizes = [2, 8, 8], strides = [1, 1, 1]} : vector<2x8x96xf32> to vector<2x8x8xf32>
    %27 = vector.extract_strided_slice %4 {offsets = [0, 0, 80], sizes = [2, 8, 8], strides = [1, 1, 1]} : vector<2x8x96xf32> to vector<2x8x8xf32>
    %28 = vector.extract_strided_slice %4 {offsets = [0, 0, 88], sizes = [2, 8, 8], strides = [1, 1, 1]} : vector<2x8x96xf32> to vector<2x8x8xf32>
    %29 = vector.shape_cast %25 : vector<2x8x8xf32> to vector<1x2x8x8xf32>
    %30 = vector.shape_cast %26 : vector<2x8x8xf32> to vector<1x2x8x8xf32>
    %31 = vector.shape_cast %27 : vector<2x8x8xf32> to vector<1x2x8x8xf32>
    %32 = vector.shape_cast %28 : vector<2x8x8xf32> to vector<1x2x8x8xf32>
    %33 = tpu.concatenate %29, %30, %31, %32 in 0 : vector<1x2x8x8xf32>, vector<1x2x8x8xf32>, vector<1x2x8x8xf32>, vector<1x2x8x8xf32> -> vector<4x2x8x8xf32>
    %34 = vector.shape_cast %33 : vector<4x2x8x8xf32> to vector<8x8x8xf32>
    "tpu.trace_start"() <{level = 10 : i32, message = "gsa,gta->gst"}> : () -> ()
    %cst_4 = arith.constant dense<0.000000e+00> : vector<8x8x8xf32>
    %35 = tpu.matmul %14, %24, %cst_4 {dimension_numbers = #tpu.dot_dimension_numbers<[2], [2], [1], [1], [0, 0, 0, 1, 1, 1], [0], [0]>} : vector<8x8x8xf32>, vector<8x8x8xf32>, vector<8x8x8xf32> -> vector<8x8x8xf32>
    "tpu.trace_stop"() : () -> ()
    %cst_5 = arith.constant 0.353553385 : f32
    %36 = vector.broadcast %cst_5 : f32 to vector<8x8x8xf32>
    %37 = arith.mulf %35, %36 : vector<8x8x8xf32>
    %cst_6 = arith.constant dense<0xFF800000> : vector<8x8xf32>
    %38 = vector.multi_reduction <maximumf>, %37, %cst_6 [2] : vector<8x8x8xf32> to vector<8x8xf32>
    %39 = vector.shape_cast %38 : vector<8x8xf32> to vector<8x8x1xf32>
    %40 = vector.broadcast %39 : vector<8x8x1xf32> to vector<8x8x8xf32>
    %41 = arith.subf %37, %40 : vector<8x8x8xf32>
    %42 = math.exp %41 : vector<8x8x8xf32>
    %cst_7 = arith.constant dense<0.000000e+00> : vector<8x8xf32>
    %43 = vector.multi_reduction <add>, %42, %cst_7 [2] : vector<8x8x8xf32> to vector<8x8xf32>
    %44 = vector.shape_cast %43 : vector<8x8xf32> to vector<8x8x1xf32>
    %45 = tpu.reciprocal %44 {approx = true} : vector<8x8x1xf32> -> vector<8x8x1xf32>
    %46 = arith.mulf %44, %45 : vector<8x8x1xf32>
    %cst_8 = arith.constant 2.000000e+00 : f32
    %47 = vector.broadcast %cst_8 : f32 to vector<8x8x1xf32>
    %48 = arith.subf %47, %46 : vector<8x8x1xf32>
    %49 = arith.mulf %45, %48 : vector<8x8x1xf32>
    %50 = vector.broadcast %49 : vector<8x8x1xf32> to vector<8x8x8xf32>
    %51 = arith.mulf %42, %50 : vector<8x8x8xf32>
    "tpu.trace_start"() <{level = 10 : i32, message = "gst,gta->gsa"}> : () -> ()
    %cst_9 = arith.constant dense<0.000000e+00> : vector<8x8x8xf32>
    %52 = tpu.matmul %51, %34, %cst_9 {dimension_numbers = #tpu.dot_dimension_numbers<[2], [1], [1], [2], [0, 0, 0, 1, 1, 2], [0], [0]>} : vector<8x8x8xf32>, vector<8x8x8xf32>, vector<8x8x8xf32> -> vector<8x8x8xf32>
    "tpu.trace_stop"() : () -> ()
    %53 = vector.shape_cast %52 : vector<8x8x8xf32> to vector<4x2x8x8xf32>
    %54 = vector.extract_strided_slice %53 {offsets = [0, 0, 0, 0], sizes = [1, 2, 8, 8], strides = [1, 1, 1, 1]} : vector<4x2x8x8xf32> to vector<1x2x8x8xf32>
    %55 = vector.shape_cast %54 : vector<1x2x8x8xf32> to vector<2x8x8xf32>
    %56 = vector.extract_strided_slice %53 {offsets = [1, 0, 0, 0], sizes = [1, 2, 8, 8], strides = [1, 1, 1, 1]} : vector<4x2x8x8xf32> to vector<1x2x8x8xf32>
    %57 = vector.shape_cast %56 : vector<1x2x8x8xf32> to vector<2x8x8xf32>
    %58 = vector.extract_strided_slice %53 {offsets = [2, 0, 0, 0], sizes = [1, 2, 8, 8], strides = [1, 1, 1, 1]} : vector<4x2x8x8xf32> to vector<1x2x8x8xf32>
    %59 = vector.shape_cast %58 : vector<1x2x8x8xf32> to vector<2x8x8xf32>
    %60 = vector.extract_strided_slice %53 {offsets = [3, 0, 0, 0], sizes = [1, 2, 8, 8], strides = [1, 1, 1, 1]} : vector<4x2x8x8xf32> to vector<1x2x8x8xf32>
    %61 = vector.shape_cast %60 : vector<1x2x8x8xf32> to vector<2x8x8xf32>
    %62 = tpu.concatenate %55, %57, %59, %61 in 2 : vector<2x8x8xf32>, vector<2x8x8xf32>, vector<2x8x8xf32>, vector<2x8x8xf32> -> vector<2x8x32xf32>
    %63 = vector.shape_cast %62 : vector<2x8x32xf32> to vector<16x32xf32>
    %c0_10 = arith.constant 0 : index
    %c0_11 = arith.constant 0 : index
    %64 = vector.load %arg2[%c0_10, %c0_11] : memref<32x32xf32, #tpu.memory_space<vmem>>, vector<32x32xf32>
    %cst_12 = arith.constant dense<0.000000e+00> : vector<16x32xf32>
    %65 = tpu.matmul %63, %64, %cst_12 {dimension_numbers = #tpu.dot_dimension_numbers<[1], [0], [0], [1], [0, 0, 1, 1], [], []>} : vector<16x32xf32>, vector<32x32xf32>, vector<16x32xf32> -> vector<16x32xf32>
    %66 = vector.shape_cast %65 : vector<16x32xf32> to vector<2x8x32xf32>
    %c0_13 = arith.constant 0 : index
    %c0_14 = arith.constant 0 : index
    %c0_15 = arith.constant 0 : index
    %67 = vector.load %arg3[%c0_13, %c0_14, %c0_15] : memref<2x8x32xf32, #tpu.memory_space<vmem>>, vector<2x8x32xf32>
    tpu.vector_store %arg3[%c0_13, %c0_14, %c0_15], %66 {strides = array<i32>} : memref<2x8x32xf32, #tpu.memory_space<vmem>>, vector<2x8x32xf32>,
    return
  }
}

</mosaic_0001>

<bundles_post_ra>
// kernel: tpu_custom_call.1
= control target key start
LH: loop header
LB: loop body
LE: loop exit
PB: predicated region body
PF: predicated region fallthrough
CT: control target
= control target key end

     0   :  { %8 = vsyncpa [#allocation3], 0  ;;  %s1112_s0 = inlined_call_operand.hbm [shape: f32[2,8,32], index: 0, kind: input, shape index: {}]   ;;  %s1113_s1 = inlined_call_operand.hbm [shape: f32[32,96], index: 1, kind: input, shape index: {}]   ;;  %s1114_s2 = inlined_call_operand.hbm [shape: f32[32,32], index: 2, kind: input, shape index: {}]   ;;  %s1115_s3 = inlined_call_operand.hbm [shape: f32[2,8,32], index: 3, kind: output, shape index: {}]  }
   0x1   :  { %9 = vsyncpa [#allocation6], 0 }
   0x2   :  { %10 = vsyncpa [#allocation4], 0  ;;  %s28_s14 = sshll.u32 %s1113_s1, 4  ;;  %s926_s15 = smov [#allocation5]   ;;  %s29_s14 = int_to_ptr.hbm [resolvable:$true] %s28_s14 }
   0x3   :  { %s30_s16 = sshll.u32 %s926_s15, 4  ;;  %s15_s19 = sshll.u32 %s1112_s0, 4  ;;  %s31_s16 = int_to_ptr.vmem [resolvable:$true] %s30_s16  ;;  %s16_s19 = int_to_ptr.hbm [resolvable:$true] %s15_s19 }
   0x4   :  { %s927_s20 = smov 128   ;;  %s928_s21 = smov 8  }
   0x5   :  { %36 = dma.hbm_to_vmem [thread:$0]  %s29_s14, 512, %s31_s16, [#allocation6], %s927_s20, %s927_s20, %s928_s21  }
   0x6   :  { %s929_s22 = smov [#allocation2]   ;;  %s41_s1 = sshll.u32 %s1114_s2, 4  ;;  %s42_s1 = int_to_ptr.hbm [resolvable:$true] %s41_s1 }
   0x7   :  { %s17_s23 = sshll.u32 %s929_s22, 4  ;;  %s930_s0 = smov [#allocation7]   ;;  %s18_s23 = int_to_ptr.vmem [resolvable:$true] %s17_s23 }
   0x8   :  { %23 = dma.hbm_to_vmem [thread:$0]  %s16_s19, 256, %s18_s23, [#allocation3], %s927_s20, %s927_s20, %s928_s21  }
   0x9   :  { %s43_s26 = sshll.u32 %s930_s0, 4  ;;  %s44_s26 = int_to_ptr.vmem [resolvable:$true] %s43_s26 }
   0xa   :  { %49 = dma.hbm_to_vmem [thread:$0]  %s42_s1, 512, %s44_s26, [#allocation6], %s927_s20, %s927_s20, %s928_s21  }
   0xb   :  { %920 = dma.done.wait [#allocation3], 256  }
   0xc   :  { %921 = vsyncadd [#allocation3], 4294967040 }
   0xd   :  { %922 = dma.done.wait [#allocation6], 1024  }
   0xe   :  { %923 = vsyncadd [#allocation6], 4294966272  ;;  %v67_v0 = vld [vmem:[#allocation5 + $0x18] sm:$0xff]  ;;  %v66_v1 = vld [vmem:[#allocation5 + $0x10] sm:$0xff]  ;;  %vm68_vm0 = vcmask 261120   ;;  %s931_s2 = smov 104  }
   0xf   :  { %87 = vmatpush.msra.mxu0 %v67_v0  ;;  %v65_v2 = vld [vmem:[#allocation5 + $0x8] sm:$0xff]  ;;  %v64_v3 = vld [vmem:[#allocation5] sm:$0xff]  ;;  %v62_v4 = vld [vmem:[#allocation2] sm:$0xff]  ;;  %s932_s27 = smov 112   ;;  %s933_s28 = smov 120   ;;  %vm114_vm1 = vcmask 64512  }
  0x10   :  { %v63_v5 = vld [vmem:[#allocation2 + $0x8] sm:$0xff]  ;;  %s934_s29 = smov 96   ;;  %s935_s30 = smov 64   ;;  %vm675_vm2 = vcmask 130048   ;;  %vm678_vm3 = vcmask 195584  }
  0x11   :  { %88 = vmatpush.msra.mxu0 %v66_v1  ;;  %s936_s4 = smov 16   ;;  %s937_s5 = smov 24  }
  0x12   :  { %s938_s6 = smov [#allocation8]   ;;  %s722_s10 = sshll.u32 %s1115_s3, 4  ;;  %s723_s10 = int_to_ptr.hbm [resolvable:$true] %s722_s10 }
  0x13   :  { %89 = vmatpush.msra.mxu0 %v65_v2  ;;  %s720_s7 = sshll.u32 %s938_s6, 4  ;;  %s721_s7 = int_to_ptr.vmem [resolvable:$true] %s720_s7 }
  0x15   :  { %90 = vmatpush.msra.mxu0 %v64_v3 }
  0x16   :  { %736 = vmatmul.msk.f32.vlgmr.msra.gmra.mxu0 %vm68_vm0, %v62_v4 }
  0x1e   :  { %737 = vmatmul.msk.f32.gmra.mxu0 %vm68_vm0, %v63_v5 }
  0x93   :  { %v979_v6 = vpop.f32.mrf.mxu0 }
  0x94   :  { %108 = vrot.lane.b32.xlu2 %v979_v6, %s931_s2  ;;  %104 = vrot.lane.b32.xlu0 %v979_v6, %s932_s27 }
  0x9b   :  { %v983_v7 = vpop.f32.mrf.mxu0 }
  0x9c   :  { %100 = vrot.lane.b32.xlu0 %v979_v6, %s933_s28  ;;  %106 = vrot.lane.b32.xlu2 %v983_v7, %s932_s27 }
  0x9d   :  { %102 = vrot.lane.b32.xlu1 %v983_v7, %s933_s28 }
  0xa4   :  { %139 = vrot.lane.b32.xlu0 %v983_v7, %s934_s29 }
  0xa5   :  { %110 = vrot.lane.b32.xlu1 %v983_v7, %s931_s2 }
  0xad   :  { %112 = vrot.lane.b32.xlu1 %v979_v6, %s934_s29 }
  0xee   :  { %v994_v9 = vpop.permute.xlu2 %108 }
  0xf6   :  { %v1002_v13 = vpop.permute.xlu2 %106 }
 0x106   :  { %v991_v8 = vpop.permute.xlu0 %104 }
 0x107   :  { %217 = vrot.lane.b32.xlu2 %v991_v8, %s934_s29 }
 0x10e   :  { %v996_v10 = vpop.permute.xlu0 %100 }
 0x10f   :  { %v998_v11 = vpop.permute.xlu1 %102  ;;  %165 = vrot.lane.b32.xlu0 %v996_v10, %s934_s29  ;;  %v777_v56 = vpack.i.bf16 %v996_v10, %v979_v6 }
 0x110   :  { %191 = vrot.lane.b32.xlu1 %v998_v11, %s934_s29 }
 0x116   :  { %v140_v12 = vpop.permute.xlu0 %139 }
 0x117   :  { %v1004_v14 = vpop.permute.xlu1 %110  ;;  %269 = vrot.lane.b32.xlu0 %v994_v9, %s934_s29  ;;  %740 = vmatpush.xpose.msk.msra.mxu2 %vm114_vm1, %v140_v12 }
 0x118   :  { %243 = vrot.lane.b32.xlu1 %v1002_v13, %s934_s29  ;;  %295 = vrot.lane.b32.xlu2 %v1004_v14, %s934_s29 }
 0x11a   :  { %741 = vmatmul.msk.f32.vlgmr.msra.gmra.mxu2 %vm114_vm1, %v983_v7 }
 0x11f   :  { %v113_v15 = vpop.permute.xlu1 %112 }
 0x120   :  { %738 = vmatpush.xpose.msk.msra.mxu1 %vm114_vm1, %v113_v15 }
 0x123   :  { %739 = vmatmul.msk.f32.vlgmr.msra.gmra.mxu1 %vm114_vm1, %v979_v6 }
 0x161   :  { %v218_v16 = vpop.permute.xlu2 %217 }
 0x162   :  { %746 = vmatpush.xpose.msk.msrb.mxu2 %vm114_vm1, %v218_v16 }
 0x165   :  { %747 = vmatmul.msk.f32.vlgmr.msrb.gmra.mxu2 %vm114_vm1, %v991_v8 }
 0x172   :  { %v296_v17 = vpop.permute.xlu2 %295 }
 0x173   :  { %752 = vmatpush.xpose.msk.msra.mxu2 %vm114_vm1, %v296_v17 }
 0x176   :  { %753 = vmatmul.msk.f32.vlgmr.msra.gmra.mxu2 %vm114_vm1, %v1004_v14 }
 0x181   :  { %v166_v18 = vpop.permute.xlu0 %165 }
 0x182   :  { %v192_v19 = vpop.permute.xlu1 %191  ;;  %742 = vmatpush.xpose.msk.msrb.mxu0 %vm114_vm1, %v166_v18 }
 0x183   :  { %744 = vmatpush.xpose.msk.msrb.mxu1 %vm114_vm1, %v192_v19 }
 0x185   :  { %743 = vmatmul.msk.f32.vlgmr.msrb.gmra.mxu0 %vm114_vm1, %v996_v10 }
 0x186   :  { %745 = vmatmul.msk.f32.vlgmr.msrb.gmra.mxu1 %vm114_vm1, %v998_v11 }
 0x189   :  { %v270_v20 = vpop.permute.xlu0 %269 }
 0x18a   :  { %v244_v21 = vpop.permute.xlu1 %243  ;;  %750 = vmatpush.xpose.msk.msra.mxu1 %vm114_vm1, %v270_v20 }
 0x18b   :  { %748 = vmatpush.xpose.msk.msra.mxu3 %vm114_vm1, %v244_v21 }
 0x18e   :  { %749 = vmatmul.msk.f32.vlgmr.msra.gmra.mxu3 %vm114_vm1, %v1002_v13  ;;  %751 = vmatmul.msk.f32.vlgmr.msra.gmra.mxu1 %vm114_vm1, %v994_v9 }
 0x19d   :  { %v162_v25 = vpop.f32.mrf.mxu2 }
 0x19e   :  { %v322_v26 = vmul.f32 0.35355338, %v162_v25 }
 0x1a0   :  { %v136_v22 = vpop.f32.mrf.mxu1  ;;  %v332_v27 = vsel %vm114_vm1, %v322_v26, -inf }
 0x1a1   :  { %v321_v23 = vmul.f32 0.35355338, %v136_v22 }
 0x1a3   :  { %v329_v24 = vsel %vm114_vm1, %v321_v23, -inf }
 0x1a4   :  { %330 = vmax.xlane.f32.xlu2 %v329_v24 }
 0x1ac   :  { %333 = vmax.xlane.f32.xlu2 %v332_v27 }
 0x1e8   :  { %v240_v28 = vpop.f32.mrf.mxu2 }
 0x1e9   :  { %v325_v29 = vmul.f32 0.35355338, %v240_v28 }
 0x1eb   :  { %v341_v30 = vsel %vm114_vm1, %v325_v29, -inf }
 0x1ec   :  { %342 = vmax.xlane.f32.xlu1 %v341_v30 }
 0x1f9   :  { %v318_v31 = vpop.f32.mrf.mxu2 }
 0x1fa   :  { %v328_v32 = vmul.f32 0.35355338, %v318_v31 }
 0x1fc   :  { %v350_v33 = vsel %vm114_vm1, %v328_v32, -inf }
 0x1fd   :  { %351 = vmax.xlane.f32.xlu1 %v350_v33 }
 0x202   :  { %v188_v34 = vpop.f32.mrf.mxu0 }
 0x203   :  { %v323_v35 = vmul.f32 0.35355338, %v188_v34  ;;  %v214_v36 = vpop.f32.mrf.mxu1 }
 0x204   :  { %v324_v37 = vmul.f32 0.35355338, %v214_v36 }
 0x205   :  { %v335_v38 = vsel %vm114_vm1, %v323_v35, -inf }
 0x206   :  { %336 = vmax.xlane.f32.xlu0 %v335_v38  ;;  %v338_v39 = vsel %vm114_vm1, %v324_v37, -inf }
 0x207   :  { %339 = vmax.xlane.f32.xlu2 %v338_v39 }
 0x20b   :  { %v292_v51 = vpop.f32.mrf.mxu1 }
 0x20c   :  { %v327_v52 = vmul.f32 0.35355338, %v292_v51 }
 0x20e   :  { %v347_v55 = vsel %vm114_vm1, %v327_v52, -inf }
 0x211   :  { %v266_v40 = vpop.f32.mrf.mxu3 }
 0x212   :  { %v326_v41 = vmul.f32 0.35355338, %v266_v40 }
 0x214   :  { %v344_v42 = vsel %vm114_vm1, %v326_v41, -inf }
 0x215   :  { %345 = vmax.xlane.f32.xlu2 %v344_v42 }
 0x217   :  { %v331_v43 = vpop.xlane.xlu2 %330 }
 0x218   :  { %v353_v44 = vsub.f32 %v321_v23, %v331_v43 }
 0x21a   :  { %v361_v45 = vmul.f32 1.442695, %v353_v44 }
 0x21c   :  { %792 = vpow2.f32 %v361_v45 }
 0x21f   :  { %v334_v46 = vpop.xlane.xlu2 %333 }
 0x220   :  { %v354_v47 = vsub.f32 %v322_v26, %v334_v46 }
 0x222   :  { %v1040_v48 = vpop.eup %792  ;;  %v363_v49 = vmul.f32 1.442695, %v354_v47 }
 0x223   :  { %v377_v50 = vsel %vm114_vm1, %v1040_v48, 0.0 }
 0x224   :  { %794 = vpow2.f32 %v363_v49  ;;  %378 = vadd.xlane.f32.xlu0 %v377_v50 }
 0x22a   :  { %v1044_v53 = vpop.eup %794 }
 0x22b   :  { %v380_v54 = vsel %vm114_vm1, %v1044_v53, 0.0 }
 0x22c   :  { %381 = vadd.xlane.f32.xlu1 %v380_v54  ;;  %348 = vmax.xlane.f32.xlu0 %v347_v55 }
 0x240   :  { %778 = vrot.lane.b32.xlu0 %v777_v56, %s935_s30 }
 0x25f   :  { %v343_v57 = vpop.xlane.xlu1 %342 }
 0x260   :  { %v357_v58 = vsub.f32 %v325_v29, %v343_v57  ;;  %v782_v29 = vpack.i.bf16 %v998_v11, %v991_v8  ;;  %v787_v8 = vpack.i.bf16 %v994_v9, %v983_v7 }
 0x262   :  { %v369_v59 = vmul.f32 1.442695, %v357_v58 }
 0x264   :  { %796 = vpow2.f32 %v369_v59 }
 0x26a   :  { %v1052_v60 = vpop.eup %796 }
 0x26b   :  { %v389_v61 = vsel %vm114_vm1, %v1052_v60, 0.0 }
 0x26c   :  { %390 = vadd.xlane.f32.xlu2 %v389_v61 }
 0x270   :  { %v352_v62 = vpop.xlane.xlu1 %351 }
 0x271   :  { %v360_v3 = vsub.f32 %v328_v32, %v352_v62 }
 0x273   :  { %v375_v6 = vmul.f32 1.442695, %v360_v3 }
 0x279   :  { %v337_v63 = vpop.xlane.xlu0 %336 }
 0x27a   :  { %v355_v0 = vsub.f32 %v323_v35, %v337_v63  ;;  %v340_v1 = vpop.xlane.xlu2 %339 }
 0x27b   :  { %v356_v2 = vsub.f32 %v324_v37, %v340_v1 }
 0x27c   :  { %v365_v4 = vmul.f32 1.442695, %v355_v0 }
 0x27d   :  { %v367_v5 = vmul.f32 1.442695, %v356_v2 }
 0x27e   :  { %798 = vpow2.f32 %v365_v4 }
 0x27f   :  { %800 = vpow2.f32 %v367_v5 }
 0x280   :  { %802 = vpow2.f32 %v375_v6 }
 0x284   :  { %v799_v10 = vpop.eup %798 }
 0x285   :  { %v1056_v12 = vpop.eup %800  ;;  %v383_v15 = vsel %vm114_vm1, %v799_v10, 0.0 }
 0x286   :  { %384 = vadd.xlane.f32.xlu1 %v383_v15  ;;  %v386_v16 = vsel %vm114_vm1, %v1056_v12, 0.0  ;;  %v1061_v19 = vpop.eup %802 }
 0x287   :  { %387 = vadd.xlane.f32.xlu0 %v386_v16  ;;  %v398_v21 = vsel %vm114_vm1, %v1061_v19, 0.0 }
 0x288   :  { %v346_v17 = vpop.xlane.xlu2 %345 }
 0x289   :  { %v358_v18 = vsub.f32 %v326_v41, %v346_v17 }
 0x28b   :  { %v371_v20 = vmul.f32 1.442695, %v358_v18 }
 0x28d   :  { %804 = vpow2.f32 %v371_v20 }
 0x28e   :  { %399 = vadd.xlane.f32.xlu1 %v398_v21 }
 0x293   :  { %v1065_v22 = vpop.eup %804 }
 0x294   :  { %v392_v23 = vsel %vm114_vm1, %v1065_v22, 0.0 }
 0x295   :  { %393 = vadd.xlane.f32.xlu2 %v392_v23 }
 0x297   :  { %v379_v24 = vpop.xlane.xlu0 %378 }
 0x298   :  { %806 = vrcp.f32 %v379_v24 }
 0x29b   :  { %623 = vrot.lane.b32.xlu0 %v1004_v14, %s935_s30 }
 0x29e   :  { %v807_v28 = vpop.eup %806 }
 0x29f   :  { %v349_v25 = vpop.xlane.xlu0 %348  ;;  %v409_v30 = vmul.f32 %v807_v28, %v379_v24  ;;  %v382_v11 = vpop.xlane.xlu1 %381 }
 0x2a0   :  { %v359_v26 = vsub.f32 %v327_v52, %v349_v25 }
 0x2a1   :  { %v417_v32 = vsub.f32 2.0, %v409_v30 }
 0x2a2   :  { %v373_v27 = vmul.f32 1.442695, %v359_v26 }
 0x2a3   :  { %571 = vrot.lane.b32.xlu0 %v1002_v13, %s935_s30  ;;  %v425_v33 = vmul.f32 %v807_v28, %v417_v32 }
 0x2a4   :  { %808 = vpow2.f32 %v373_v27 }
 0x2a5   :  { %v433_v13 = vmul.f32 %v1040_v48, %v425_v33 }
 0x2a7   :  { %783 = vrot.lane.b32.xlu1 %v782_v29, %s935_s30 }
 0x2aa   :  { %v1076_v31 = vpop.eup %808 }
 0x2ab   :  { %v395_v14 = vsel %vm114_vm1, %v1076_v31, 0.0 }
 0x2ac   :  { %396 = vadd.xlane.f32.xlu2 %v395_v14 }
 0x2b2   :  { %v779_v34 = vpop.permute.xlu0 %778 }
 0x2b3   :  { %v781_v35 = vunpack.i.h.bf16 %v779_v34  ;;  %v780_v36 = vunpack.i.l.bf16 %v779_v34  ;;  %v683_v34 = vld [vmem:[#allocation7 + $0x10] sm:$0xff] }
 0x2b5   :  { %462 = vmatpush.msrb.mxu3 %v780_v36  ;;  %514 = vmatpush.msrb.mxu1 %v781_v35  ;;  %v682_v35 = vld [vmem:[#allocation7 + $0x8] sm:$0xff]  ;;  %v681_v36 = vld [vmem:[#allocation7] sm:$0xff] }
 0x2b6   :  { %754 = vmatmul.msk.f32.vlgmr.msrb.gmra.mxu3 %vm114_vm1, %v433_v13 }
 0x2c4   :  { %788 = vrot.lane.b32.xlu2 %v787_v8, %s935_s30 }
 0x2df   :  { %v391_v40 = vpop.xlane.xlu2 %390 }
 0x2f9   :  { %v385_v37 = vpop.xlane.xlu1 %384 }
 0x2fa   :  { %810 = vrcp.f32 %v385_v37  ;;  %v388_v41 = vpop.xlane.xlu0 %387 }
 0x2fb   :  { %812 = vrcp.f32 %v391_v40 }
 0x2fc   :  { %814 = vrcp.f32 %v388_v41 }
 0x300   :  { %v811_v38 = vpop.eup %810 }
 0x301   :  { %v411_v39 = vmul.f32 %v811_v38, %v385_v37  ;;  %v813_v45 = vpop.eup %812  ;;  %v400_v46 = vpop.xlane.xlu1 %399 }
 0x302   :  { %v815_v47 = vpop.eup %814  ;;  %816 = vrcp.f32 %v400_v46  ;;  %v413_v7 = vmul.f32 %v813_v45, %v391_v40 }
 0x303   :  { %v419_v42 = vsub.f32 2.0, %v411_v39  ;;  %v412_v9 = vmul.f32 %v815_v47, %v388_v41  ;;  %818 = vrcp.f32 %v382_v11 }
 0x304   :  { %v421_v48 = vsub.f32 2.0, %v413_v7 }
 0x305   :  { %v427_v43 = vmul.f32 %v811_v38, %v419_v42  ;;  %v420_v49 = vsub.f32 2.0, %v412_v9 }
 0x306   :  { %v429_v51 = vmul.f32 %v813_v45, %v421_v48 }
 0x307   :  { %v435_v44 = vmul.f32 %v799_v10, %v427_v43  ;;  %v428_v52 = vmul.f32 %v815_v47, %v420_v49 }
 0x308   :  { %v817_v50 = vpop.eup %816  ;;  %v394_v55 = vpop.xlane.xlu2 %393  ;;  %v437_v61 = vmul.f32 %v1052_v60, %v429_v51 }
 0x309   :  { %756 = vmatmul.msk.f32.vlgmr.msrb.gmra.mxu1 %vm114_vm1, %v435_v44  ;;  %v416_v54 = vmul.f32 %v817_v50, %v400_v46  ;;  %v819_v57 = vpop.eup %818  ;;  %v436_v62 = vmul.f32 %v1056_v12, %v428_v52  ;;  %820 = vrcp.f32 %v394_v55 }
 0x30a   :  { %v410_v0 = vmul.f32 %v819_v57, %v382_v11 }
 0x30b   :  { %v424_v63 = vsub.f32 2.0, %v416_v54 }
 0x30c   :  { %v418_v4 = vsub.f32 2.0, %v410_v0 }
 0x30d   :  { %v624_v1 = vpop.permute.xlu0 %623  ;;  %v432_v2 = vmul.f32 %v817_v50, %v424_v63 }
 0x30e   :  { %v426_v6 = vmul.f32 %v819_v57, %v418_v4 }
 0x30f   :  { %v821_v5 = vpop.eup %820  ;;  %v440_v60 = vmul.f32 %v1061_v19, %v432_v2 }
 0x310   :  { %v414_v10 = vmul.f32 %v821_v5, %v394_v55  ;;  %v434_v20 = vmul.f32 %v1044_v53, %v426_v6 }
 0x312   :  { %v422_v21 = vsub.f32 2.0, %v414_v10 }
 0x314   :  { %v430_v19 = vmul.f32 %v821_v5, %v422_v21 }
 0x315   :  { %v572_v24 = vpop.permute.xlu0 %571 }
 0x316   :  { %v438_v27 = vmul.f32 %v1065_v22, %v430_v19  ;;  %v684_v22 = vld [vmem:[#allocation7 + $0x18] sm:$0xff] }
 0x319   :  { %v784_v56 = vpop.permute.xlu1 %783 }
 0x31a   :  { %v786_v58 = vunpack.i.h.bf16 %v784_v56  ;;  %v785_v59 = vunpack.i.l.bf16 %v784_v56 }
 0x31c   :  { %540 = vmatpush.msrb.mxu2 %v786_v58  ;;  %566 = vmatpush.msra.mxu3 %v785_v59 }
 0x31d   :  { %757 = vmatmul.msk.f32.vlgmr.msrb.gmra.mxu2 %vm114_vm1, %v436_v62  ;;  %758 = vmatmul.msk.f32.vlgmr.msra.gmra.mxu3 %vm114_vm1, %v437_v61 }
 0x31e   :  { %644 = vmatpush.msra.mxu2 %v624_v1  ;;  %703 = vmatpush.msrb.mxu3 %v684_v22 }
 0x31f   :  { %v397_v3 = vpop.xlane.xlu2 %396 }
 0x320   :  { %822 = vrcp.f32 %v397_v3  ;;  %704 = vmatpush.msrb.mxu3 %v683_v34 }
 0x322   :  { %705 = vmatpush.msrb.mxu3 %v682_v35 }
 0x324   :  { %706 = vmatpush.msrb.mxu3 %v681_v36 }
 0x325   :  { %761 = vmatmul.msk.f32.vlgmr.msra.gmra.mxu2 %vm114_vm1, %v440_v60 }
 0x326   :  { %v823_v12 = vpop.eup %822 }
 0x327   :  { %v415_v15 = vmul.f32 %v823_v12, %v397_v3  ;;  %v789_v16 = vpop.permute.xlu2 %788 }
 0x328   :  { %v791_v17 = vunpack.i.h.bf16 %v789_v16  ;;  %v790_v18 = vunpack.i.l.bf16 %v789_v16 }
 0x329   :  { %v423_v23 = vsub.f32 2.0, %v415_v15 }
 0x32a   :  { %488 = vmatpush.msra.mxu0 %v790_v18  ;;  %618 = vmatpush.msra.mxu1 %v791_v17 }
 0x32b   :  { %v431_v25 = vmul.f32 %v823_v12, %v423_v23  ;;  %755 = vmatmul.msk.f32.vlgmr.msra.gmra.mxu0 %vm114_vm1, %v434_v20 }
 0x32c   :  { %592 = vmatpush.msrb.mxu0 %v572_v24 }
 0x32d   :  { %v439_v26 = vmul.f32 %v1076_v31, %v431_v25 }
 0x32f   :  { %760 = vmatmul.msk.f32.vlgmr.msra.gmra.mxu1 %vm114_vm1, %v439_v26 }
 0x333   :  { %759 = vmatmul.msk.f32.vlgmr.msrb.gmra.mxu0 %vm114_vm1, %v438_v27 }
 0x339   :  { %v464_v53 = vpop.f32.mrf.mxu3 }
 0x386   :  { %v516_v28 = vpop.f32.mrf.mxu1 }
 0x387   :  { %651 = vrot.lane.b32.xlu1 %v516_v28, %s928_s21 }
 0x3a0   :  { %v542_v29 = vpop.f32.mrf.mxu2  ;;  %v568_v30 = vpop.f32.mrf.mxu3 }
 0x3a1   :  { %653 = vrot.lane.b32.xlu1 %v542_v29, %s928_s21  ;;  %659 = vrot.lane.b32.xlu0 %v568_v30, %s936_s4 }
 0x3a8   :  { %v490_v14 = vpop.f32.mrf.mxu0  ;;  %v646_v33 = vpop.f32.mrf.mxu2 }
 0x3ac   :  { %v620_v32 = vpop.f32.mrf.mxu1 }
 0x3ad   :  { %667 = vrot.lane.b32.xlu2 %v620_v32, %s937_s5 }
 0x3b0   :  { %v594_v31 = vpop.f32.mrf.mxu0 }
 0x3b1   :  { %661 = vrot.lane.b32.xlu0 %v594_v31, %s936_s4 }
 0x3b5   :  { %669 = vrot.lane.b32.xlu2 %v646_v33, %s937_s5 }
 0x3f9   :  { %v652_v13 = vpop.permute.xlu1 %651 }
 0x3fa   :  { %v673_v8 = vsel %vm114_vm1, %v464_v53, %v652_v13 }
 0x407   :  { %v668_v37 = vpop.permute.xlu2 %667 }
 0x40f   :  { %v670_v43 = vpop.permute.xlu2 %669 }
 0x413   :  { %v660_v11 = vpop.permute.xlu0 %659  ;;  %v654_v40 = vpop.permute.xlu1 %653 }
 0x414   :  { %v676_v38 = vsel %vm675_vm2, %v673_v8, %v660_v11  ;;  %v674_v41 = vsel %vm114_vm1, %v490_v14, %v654_v40 }
 0x415   :  { %v679_v39 = vsel %vm678_vm3, %v676_v38, %v668_v37 }
 0x416   :  { %762 = vmatmul.msk.f32.vlgmr.msrb.gmra.mxu3 %vm68_vm0, %v679_v39 }
 0x423   :  { %v662_v42 = vpop.permute.xlu0 %661 }
 0x424   :  { %v677_v44 = vsel %vm675_vm2, %v674_v41, %v662_v42 }
 0x425   :  { %v680_v45 = vsel %vm678_vm3, %v677_v44, %v670_v43 }
 0x426   :  { %763 = vmatmul.msk.f32.gmra.mxu3 %vm68_vm0, %v680_v45 }
 0x499   :  { %v708_v46 = vpop.f32.mrf.mxu3 }
 0x49a   :  { %714 = vst.msk [vmem:[#allocation8] sm:$0xff] %vm68_vm0, %v708_v46 }
 0x4a9   :  { %v711_v47 = vpop.f32.mrf.mxu3 }
 0x4aa   :  { %715 = vst.msk [vmem:[#allocation8 + $0x8] sm:$0xff] %vm68_vm0, %v711_v47 }
 0x4ab   :  { %728 = dma.vmem_to_hbm [thread:$0]  %s721_s7, 256, %s723_s10, [#allocation4], %s927_s20, %s927_s20, %s928_s21  }
 0x4ac   :  { %924 = dma.done.wait [#allocation4], 256  }
 0x4ad   :  { %925 = vsyncadd [#allocation4], 4294967040 }
 0x4ae   :  { %733 = vsyncpa [#allocation3], 1 }
 0x4af   :  { %734 = vsyncpa [#allocation6], 1 }
 0x4b0   :  { %735 = vsyncpa [#allocation4], 1 }

</bundles_post_ra>
